<compile_context>
chip_gen: v6e
topology: v6e:2x2x1
jax: 0.10.0
libtpu: 0.0.40
codegen_flags: <defaults>
</compile_context>

<pallas_src>
import functools

import jax
import jax.numpy as jnp
from jax.experimental import pallas as pl
from jax.experimental.pallas import tpu as pltpu


def _image_proj_kernel(x_ref, w_ref, b_ref, g_ref, beta_ref, o_ref, *, d_out):
    # x_ref:    (tb, clip_dim)  bf16   (resident while W streams)
    # w_ref:    (clip_dim, tn)  bf16   (pre-transposed Linear weight column tile)
    # b_ref:    (1, tn)         f32    bias slice
    # g_ref:    (1, d_out)      f32    LayerNorm gamma
    # beta_ref: (1, d_out)      f32    LayerNorm beta
    # o_ref:    (tb, tn)        lane-dense 2-D output slab, tn = toks_in_tile * d_out
    tb, tn = o_ref.shape
    toks = tn // d_out

    # Hot path: projection matmul on the MXU (bf16 x bf16 -> f32 accumulate).
    y = jnp.dot(x_ref[...], w_ref[...], preferred_element_type=jnp.float32)
    y = y + b_ref[...]                                  # (tb, tn) f32

    gamma = g_ref[...]                                  # (1, d_out)
    beta = beta_ref[...]                                # (1, d_out)
    inv_d = 1.0 / d_out

    # LayerNorm per extra-context token on lane-aligned static slices.
    # Static Python unroll (toks is tiny); avoids any in-kernel reshape/relayout.
    for t in range(toks):
        lo = t * d_out
        seg = y[:, lo:lo + d_out]                       # (tb, d_out) f32
        mean = jnp.sum(seg, axis=-1, keepdims=True) * inv_d
        centered = seg - mean
        var = jnp.sum(centered * centered, axis=-1, keepdims=True) * inv_d
        normed = centered * jax.lax.rsqrt(var + 1e-5) * gamma + beta
        o_ref[:, lo:lo + d_out] = normed.astype(o_ref.dtype)


def prepare_image_proj_params(proj_w, proj_b, ln_gamma, ln_beta,
                              *, weight_dtype=jnp.bfloat16):
    """One-time parameter prep (do this at load time, NOT per forward call).

    proj_w: torch nn.Linear layout [T*cross_attention_dim, clip_embeddings_dim].
    Returns (w_t, bias2d, gamma2d, beta2d) with w_t = proj_w.T cast to `weight_dtype`.
    """
    w_t = jnp.asarray(proj_w).T.astype(weight_dtype)                # [clip_dim, T*D]
    b2 = jnp.asarray(proj_b, dtype=jnp.float32).reshape(1, -1)      # [1, T*D]
    g2 = jnp.asarray(ln_gamma, dtype=jnp.float32).reshape(1, -1)    # [1, D]
    be2 = jnp.asarray(ln_beta, dtype=jnp.float32).reshape(1, -1)    # [1, D]
    return w_t, b2, g2, be2


def _footprint_bytes(tb, tn, clip_dim, d_out, w_bytes, x_bytes, o_bytes):
    """Approximate VMEM footprint for one grid step (double-buffered BlockSpecs)."""
    wt = 2 * clip_dim * tn * w_bytes            # W tile, double-buffered
    xt = 2 * tb * clip_dim * x_bytes            # x tile
    ot = 2 * tb * tn * o_bytes                  # output tile
    bias = 2 * 8 * tn * 4                       # (1, tn) pads to 8 sublanes
    gb = 2 * 2 * 8 * d_out * 4                  # gamma + beta
    scratch = 3 * tb * tn * 4                   # f32 intermediates (y, centered, normed)
    return wt + xt + ot + bias + gb + scratch


def _choose_tokens_per_tile(T, D, tb, clip_dim, w_bytes, x_bytes, o_bytes,
                            vmem_budget_bytes, min_n_tiles):
    """Pick tokens/N-tile: fit VMEM budget, keep N tiles >= min_n_tiles and even
    when T allows it (v7x megacore splits the W stream across both TCs)."""
    def lane_ok(d):
        tn = d * D
        return (tn % 128 == 0) or (d == T)      # last block dim mult of 128 or full

    divisors = [d for d in range(1, T + 1) if T % d == 0 and lane_ok(d)]
    if not divisors:
        divisors = [T]
    fitting = [d for d in divisors
               if _footprint_bytes(tb, d * D, clip_dim, D, w_bytes, x_bytes, o_bytes)
               <= vmem_budget_bytes]
    if not fitting:
        fitting = [min(divisors)]

    even_ok = [d for d in fitting if (T // d) >= min_n_tiles and (T // d) % 2 == 0]
    min_ok = [d for d in fitting if (T // d) >= min_n_tiles]
    if even_ok:
        return max(even_ok)
    if min_ok:
        return max(min_ok)
    return max(fitting)


def image_proj_model_forward(image_embeds, w_t, bias2d, gamma2d, beta2d,
                             *, clip_extra_context_tokens, cross_attention_dim,
                             vmem_budget_bytes=40 * 1024 * 1024, min_n_tiles=2):
    """image_embeds: [B, clip_dim]; w_t: pre-transposed [clip_dim, T*D] (bf16)."""
    B, clip_dim = image_embeds.shape
    T = clip_extra_context_tokens
    D = cross_attention_dim
    N = T * D
    assert w_t.shape == (clip_dim, N)
    assert bias2d.shape == (1, N)
    assert gamma2d.shape == (1, D) and beta2d.shape == (1, D)

    out_dtype = image_embeds.dtype
    w_bytes = jnp.dtype(w_t.dtype).itemsize
    o_bytes = jnp.dtype(out_dtype).itemsize
    x_bytes = w_bytes

    # --- batch tiling: pad rows up to an (8,128)-friendly multiple ---
    tb = min(128, pl.next_power_of_2(max(B, 8)))
    Bp = ((B + tb - 1) // tb) * tb

    # --- N tiling: whole tokens per tile so LayerNorm is self-contained ---
    tokens_per_tile = _choose_tokens_per_tile(
        T, D, tb, clip_dim, w_bytes, x_bytes, o_bytes, vmem_budget_bytes, min_n_tiles)
    tn = tokens_per_tile * D
    n_tiles = N // tn
    b_tiles = Bp // tb

    x = image_embeds.astype(w_t.dtype)
    if Bp != B:
        x = jnp.pad(x, ((0, Bp - B), (0, 0)))

    # Grid: N axis OUTER (parallel -> v7x megacore shards the W stream),
    #       batch axis INNER (arbitrary) -> W block index changes only once per
    #       N tile, so W is DMA'd from HBM exactly once regardless of batch size.
    grid = (n_tiles, b_tiles)

    footprint = _footprint_bytes(tb, tn, clip_dim, D, w_bytes, x_bytes, o_bytes)
    vmem_limit = int(min(64 * 1024 * 1024,
                         max(footprint + 4 * 1024 * 1024, 16 * 1024 * 1024)))

    cost = pl.CostEstimate(
        flops=2 * Bp * clip_dim * N,
        transcendentals=Bp * T,                                  # rsqrt per token
        bytes_accessed=(clip_dim * N * w_bytes                   # W (dominant)
                        + Bp * clip_dim * x_bytes                # x
                        + Bp * N * o_bytes                       # out
                        + (N + 2 * D) * 4),                      # bias/gamma/beta
    )

    out2d = pl.pallas_call(
        functools.partial(_image_proj_kernel, d_out=D),
        out_shape=jax.ShapeDtypeStruct((Bp, N), out_dtype),
        grid_spec=pltpu.PrefetchScalarGridSpec(
            num_scalar_prefetch=0,
            grid=grid,
            in_specs=[
                pl.BlockSpec((tb, clip_dim), lambda n, b: (b, 0)),   # x (small, re-DMA per b)
                pl.BlockSpec((clip_dim, tn), lambda n, b: (0, n)),   # W^T tile (streamed once)
                pl.BlockSpec((1, tn), lambda n, b: (0, n)),          # bias tile
                pl.BlockSpec((1, D), lambda n, b: (0, 0)),           # gamma
                pl.BlockSpec((1, D), lambda n, b: (0, 0)),           # beta
            ],
            out_specs=pl.BlockSpec((tb, tn), lambda n, b: (b, n)),   # lane-dense 2-D slab
        ),
        compiler_params=pltpu.CompilerParams(
            dimension_semantics=("parallel", "arbitrary"),
            vmem_limit_bytes=vmem_limit),
        cost_estimate=cost,
    )(x, w_t, bias2d, gamma2d, beta2d)

    # Glue: drop batch padding and restore the (B, T, D) view (row-major, matches torch).
    return out2d[:B].reshape(B, T, D)


def _reference(image_embeds, w_t_f32, bias, gamma, beta, T, D):
    y = image_embeds @ w_t_f32 + bias
    y = y.reshape(-1, T, D)
    mean = jnp.mean(y, axis=-1, keepdims=True)
    var = jnp.mean((y - mean) ** 2, axis=-1, keepdims=True)
    return (y - mean) * jax.lax.rsqrt(var + 1e-5) * gamma + beta


if __name__ == "__main__":
    # Small, TPU-friendly shapes consistent with the module's forward.
    B = 2
    clip_embeddings_dim = 128
    cross_attention_dim = 128
    clip_extra_context_tokens = 4
    T, D = clip_extra_context_tokens, cross_attention_dim

    key = jax.random.PRNGKey(0)
    k_x, k_w, k_b, k_g, k_be = jax.random.split(key, 5)

    image_embeds = jax.random.normal(k_x, (B, clip_embeddings_dim), jnp.float32)

    # torch nn.Linear weight layout: [out_features, in_features].
    proj_w = jax.random.normal(k_w, (T * D, clip_embeddings_dim), jnp.float32) * 0.02
    proj_b = jax.random.normal(k_b, (T * D,), jnp.float32) * 0.01
    ln_gamma = 1.0 + 0.1 * jax.random.normal(k_g, (D,), jnp.float32)
    ln_beta = 0.1 * jax.random.normal(k_be, (D,), jnp.float32)

    # One-time param prep (transpose + bf16 cast hoisted out of the hot path).
    w_t, b2, g2, be2 = prepare_image_proj_params(proj_w, proj_b, ln_gamma, ln_beta)

    # min_n_tiles=2 -> 2 tokens per N tile here, so the W-streaming / pipelining
    # path (and the even-tile-count v7x policy) is exercised at these tiny shapes.
    out = image_proj_model_forward(
        image_embeds, w_t, b2, g2, be2,
        clip_extra_context_tokens=T, cross_attention_dim=D, min_n_tiles=2)
    out = jax.block_until_ready(out)
    assert out.shape == (B, T, D)

    # Strict check: reference using the exact same bf16-cast operands (f32 accumulate).
    x_cast = image_embeds.astype(jnp.bfloat16).astype(jnp.float32)
    w_cast = w_t.astype(jnp.float32)
    ref_same_prec = _reference(x_cast, w_cast, b2, g2, be2, T, D)
    assert jnp.allclose(out, ref_same_prec, atol=1e-4, rtol=1e-4)

    # Semantics check vs. full-f32 torch-equivalent math (bf16 weight quantization noise only).
    ref_f32 = _reference(image_embeds, proj_w.T.astype(jnp.float32), b2, g2, be2, T, D)
    assert jnp.allclose(out, ref_f32, atol=2e-2, rtol=2e-2)

    print("KERNEL_OK")
</pallas_src>

<mosaic_0001>
module attributes {stable_mosaic.version = 11 : i64} {
  func.func @_image_proj_kernel(%arg0: i32, %arg1: i32, %arg2: memref<8x128xbf16, #tpu.memory_space<vmem>>, %arg3: memref<128x256xbf16, #tpu.memory_space<vmem>>, %arg4: memref<1x256xf32, #tpu.memory_space<vmem>>, %arg5: memref<1x128xf32, #tpu.memory_space<vmem>>, %arg6: memref<1x128xf32, #tpu.memory_space<vmem>>, %arg7: memref<8x256xf32, #tpu.memory_space<vmem>>) attributes {dimension_semantics = [#tpu.dimension_semantics<parallel>, #tpu.dimension_semantics<arbitrary>], iteration_bounds = array<i64: 2, 1>, scalar_prefetch = 0 : i64, scratch_operands = 0 : i64, tpu.core_type = #tpu.core_type<tc>, window_params = [{transform_indices = @transform_0, window_bounds = array<i64: 8, 128>}, {transform_indices = @transform_1, window_bounds = array<i64: 128, 256>}, {transform_indices = @transform_2, window_bounds = array<i64: 1, 256>}, {pipeline_mode = #tpu.pipeline_mode<synchronous>, transform_indices = @transform_3, window_bounds = array<i64: 1, 128>}, {pipeline_mode = #tpu.pipeline_mode<synchronous>, transform_indices = @transform_4, window_bounds = array<i64: 1, 128>}, {transform_indices = @transform_5, window_bounds = array<i64: 8, 256>}]} {
    %c0 = arith.constant 0 : index
    %c0_0 = arith.constant 0 : index
    %0 = vector.load %arg2[%c0, %c0_0] : memref<8x128xbf16, #tpu.memory_space<vmem>>, vector<8x128xbf16>
    %c0_1 = arith.constant 0 : index
    %c0_2 = arith.constant 0 : index
    %1 = vector.load %arg3[%c0_1, %c0_2] : memref<128x256xbf16, #tpu.memory_space<vmem>>, vector<128x256xbf16>
    %cst = arith.constant dense<0.000000e+00> : vector<8x256xf32>
    %2 = tpu.matmul %0, %1, %cst {dimension_numbers = #tpu.dot_dimension_numbers<[1], [0], [0], [1], [0, 0, 1, 1], [], []>} : vector<8x128xbf16>, vector<128x256xbf16>, vector<8x256xf32> -> vector<8x256xf32>
    %c0_3 = arith.constant 0 : index
    %c0_4 = arith.constant 0 : index
    %3 = vector.load %arg4[%c0_3, %c0_4] : memref<1x256xf32, #tpu.memory_space<vmem>>, vector<1x256xf32>
    %4 = vector.broadcast %3 : vector<1x256xf32> to vector<8x256xf32>
    %5 = arith.addf %2, %4 : vector<8x256xf32>
    %c0_5 = arith.constant 0 : index
    %c0_6 = arith.constant 0 : index
    %6 = vector.load %arg5[%c0_5, %c0_6] : memref<1x128xf32, #tpu.memory_space<vmem>>, vector<1x128xf32>
    %c0_7 = arith.constant 0 : index
    %c0_8 = arith.constant 0 : index
    %7 = vector.load %arg6[%c0_7, %c0_8] : memref<1x128xf32, #tpu.memory_space<vmem>>, vector<1x128xf32>
    %8 = vector.extract_strided_slice %5 {offsets = [0, 0], sizes = [8, 128], strides = [1, 1]} : vector<8x256xf32> to vector<8x128xf32>
    %cst_9 = arith.constant dense<0.000000e+00> : vector<8xf32>
    %9 = vector.multi_reduction <add>, %8, %cst_9 [1] : vector<8x128xf32> to vector<8xf32>
    %10 = vector.shape_cast %9 : vector<8xf32> to vector<8x1xf32>
    %cst_10 = arith.constant 7.812500e-03 : f32
    %11 = vector.broadcast %cst_10 : f32 to vector<8x1xf32>
    %12 = arith.mulf %10, %11 : vector<8x1xf32>
    %13 = vector.broadcast %12 : vector<8x1xf32> to vector<8x128xf32>
    %14 = arith.subf %8, %13 : vector<8x128xf32>
    %15 = arith.mulf %14, %14 : vector<8x128xf32>
    %cst_11 = arith.constant dense<0.000000e+00> : vector<8xf32>
    %16 = vector.multi_reduction <add>, %15, %cst_11 [1] : vector<8x128xf32> to vector<8xf32>
    %17 = vector.shape_cast %16 : vector<8xf32> to vector<8x1xf32>
    %cst_12 = arith.constant 7.812500e-03 : f32
    %18 = vector.broadcast %cst_12 : f32 to vector<8x1xf32>
    %19 = arith.mulf %17, %18 : vector<8x1xf32>
    %cst_13 = arith.constant 9.99999974E-6 : f32
    %20 = vector.broadcast %cst_13 : f32 to vector<8x1xf32>
    %21 = arith.addf %19, %20 : vector<8x1xf32>
    %22 = math.rsqrt %21 : vector<8x1xf32>
    %23 = vector.broadcast %22 : vector<8x1xf32> to vector<8x128xf32>
    %24 = arith.mulf %14, %23 : vector<8x128xf32>
    %25 = vector.broadcast %6 : vector<1x128xf32> to vector<8x128xf32>
    %26 = arith.mulf %24, %25 : vector<8x128xf32>
    %27 = vector.broadcast %7 : vector<1x128xf32> to vector<8x128xf32>
    %28 = arith.addf %26, %27 : vector<8x128xf32>
    %c0_14 = arith.constant 0 : index
    %c0_15 = arith.constant 0 : index
    %29 = vector.load %arg7[%c0_14, %c0_15] : memref<8x256xf32, #tpu.memory_space<vmem>>, vector<8x128xf32>
    tpu.vector_store %arg7[%c0_14, %c0_15], %28 {strides = array<i32>} : memref<8x256xf32, #tpu.memory_space<vmem>>, vector<8x128xf32>,
    %30 = vector.extract_strided_slice %5 {offsets = [0, 128], sizes = [8, 128], strides = [1, 1]} : vector<8x256xf32> to vector<8x128xf32>
    %cst_16 = arith.constant dense<0.000000e+00> : vector<8xf32>
    %31 = vector.multi_reduction <add>, %30, %cst_16 [1] : vector<8x128xf32> to vector<8xf32>
    %32 = vector.shape_cast %31 : vector<8xf32> to vector<8x1xf32>
    %cst_17 = arith.constant 7.812500e-03 : f32
    %33 = vector.broadcast %cst_17 : f32 to vector<8x1xf32>
    %34 = arith.mulf %32, %33 : vector<8x1xf32>
    %35 = vector.broadcast %34 : vector<8x1xf32> to vector<8x128xf32>
    %36 = arith.subf %30, %35 : vector<8x128xf32>
    %37 = arith.mulf %36, %36 : vector<8x128xf32>
    %cst_18 = arith.constant dense<0.000000e+00> : vector<8xf32>
    %38 = vector.multi_reduction <add>, %37, %cst_18 [1] : vector<8x128xf32> to vector<8xf32>
    %39 = vector.shape_cast %38 : vector<8xf32> to vector<8x1xf32>
    %cst_19 = arith.constant 7.812500e-03 : f32
    %40 = vector.broadcast %cst_19 : f32 to vector<8x1xf32>
    %41 = arith.mulf %39, %40 : vector<8x1xf32>
    %cst_20 = arith.constant 9.99999974E-6 : f32
    %42 = vector.broadcast %cst_20 : f32 to vector<8x1xf32>
    %43 = arith.addf %41, %42 : vector<8x1xf32>
    %44 = math.rsqrt %43 : vector<8x1xf32>
    %45 = vector.broadcast %44 : vector<8x1xf32> to vector<8x128xf32>
    %46 = arith.mulf %36, %45 : vector<8x128xf32>
    %47 = vector.broadcast %6 : vector<1x128xf32> to vector<8x128xf32>
    %48 = arith.mulf %46, %47 : vector<8x128xf32>
    %49 = vector.broadcast %7 : vector<1x128xf32> to vector<8x128xf32>
    %50 = arith.addf %48, %49 : vector<8x128xf32>
    %c0_21 = arith.constant 0 : index
    %c128 = arith.constant 128 : index
    %51 = vector.load %arg7[%c0_21, %c128] : memref<8x256xf32, #tpu.memory_space<vmem>>, vector<8x128xf32>
    tpu.vector_store %arg7[%c0_21, %c128], %50 {strides = array<i32>} : memref<8x256xf32, #tpu.memory_space<vmem>>, vector<8x128xf32>,
    return
  }
  func.func @transform_0(%arg0: i32, %arg1: i32) -> (i32, i32) {
    %c0_i32 = arith.constant 0 : i32
    %c0_i32_0 = arith.constant 0 : i32
    return %arg1, %c0_i32 : i32, i32
  }
  func.func @transform_1(%arg0: i32, %arg1: i32) -> (i32, i32) {
    %c0_i32 = arith.constant 0 : i32
    %c0_i32_0 = arith.constant 0 : i32
    return %c0_i32, %arg0 : i32, i32
  }
  func.func @transform_2(%arg0: i32, %arg1: i32) -> (i32, i32) {
    %c0_i32 = arith.constant 0 : i32
    %c0_i32_0 = arith.constant 0 : i32
    return %c0_i32, %arg0 : i32, i32
  }
  func.func @transform_3(%arg0: i32, %arg1: i32) -> (i32, i32) {
    %c0_i32 = arith.constant 0 : i32
    %c0_i32_0 = arith.constant 0 : i32
    %c0_i32_1 = arith.constant 0 : i32
    return %c0_i32, %c0_i32_0 : i32, i32
  }
  func.func @transform_4(%arg0: i32, %arg1: i32) -> (i32, i32) {
    %c0_i32 = arith.constant 0 : i32
    %c0_i32_0 = arith.constant 0 : i32
    %c0_i32_1 = arith.constant 0 : i32
    return %c0_i32, %c0_i32_0 : i32, i32
  }
  func.func @transform_5(%arg0: i32, %arg1: i32) -> (i32, i32) {
    %c0_i32 = arith.constant 0 : i32
    return %arg1, %arg0 : i32, i32
  }
}

</mosaic_0001>

<bundles_post_ra>
// kernel: tpu_custom_call.1
= control target key start
LH: loop header
LB: loop body
LE: loop exit
PB: predicated region body
PF: predicated region fallthrough
CT: control target
= control target key end

     0   :  { %s1213_s0 = inlined_call_operand.hbm [shape: bf16[8,128], index: 0, kind: input, shape index: {}]   ;;  %s1214_s1 = inlined_call_operand.hbm [shape: bf16[128,512], index: 1, kind: input, shape index: {}]   ;;  %s1215_s2 = inlined_call_operand.hbm [shape: f32[1,512], index: 2, kind: input, shape index: {}]   ;;  %s1216_s3 = inlined_call_operand.vmem [shape: f32[1,128], index: 3, kind: input, shape index: {}]   ;;  %s1217_s4 = inlined_call_operand.vmem [shape: f32[1,128], index: 4, kind: input, shape index: {}]   ;;  %s1218_s5 = inlined_call_operand.hbm [shape: f32[8,512], index: 5, kind: output, shape index: {}]  }
   0x1   :  { %1224 = sst [smem:[#allocation14_spill]] %s1214_s1 }
   0x2   :  { %10 = vsyncpa [#allocation3], 0 }
   0x3   :  { %11 = vsyncpa [#allocation6], 0 }
   0x4   :  { %13 = vsyncpa [#allocation6 + $0x1], 0 }
   0x5   :  { %14 = vsyncpa [#allocation4], 0 }
   0x6   :  { %16 = vsyncpa [#allocation4 + $0x1], 0  ;;  %s998_s18 = smov 0   ;;  %s1000_s19 = smov 0  }
   0x7   :  { %s1002_s20 = smov 0   ;;  %s1004_s21 = smov 0  }
   0x8   :  { %s1006_s22 = smov 0   ;;  %s1008_s23 = smov 0  }
   0x9 LB: > { %1225 = sst [smem:[#allocation12_spill]] %s954_s22  ;;  %s34_s24 = sadd.s32 1, %s954_s22  ;;  %s958_s23 = sphi %s1008_s23, %s22_s23   ;;  %s954_s22 = sphi %s1006_s22, %s1241_s22   ;;  %s950_s21 = sphi %s1004_s21, %s1240_s21   ;;  %s946_s20 = sphi %s1002_s20, %s1244_s20   ;;  %s942_s19 = sphi %s1000_s19, %s1243_s19   ;;  %s938_s18 = sphi %s998_s18, %s1242_s18  }
   0xa   : > { %s67_s25 = sadd.s32 1, %s946_s20  ;;  %p36_p0 = scmp.ge.s32.totalorder %s34_s24, 2 }
   0xb   : > { %p74_p1 = scmp.ne.s32.totalorder %s946_s20, %s942_s19  ;;  %p75_p2 = scmp.eq.s32.totalorder %s958_s23, 0 }
   0xc   : > { %s1246_s24 = smov (%p36_p0, %s34_s24), 0  ;;  %p708_p5 = scmp.lt.s32.totalorder %s958_s23, 2 }
   0xd   : > { %1226 = sst [smem:[#allocation13_spill]] %s1246_s24  ;;  %p76_p4 = por %p75_p2, %p74_p1 }
   0xe   : > { %s64_s26 = ssub.s32 %s954_s22, %s1246_s24  ;;  %s219_s27 = sand.u32 1, %s958_s23  }
   0xf   : > { %p65_p6 = scmp.eq.s32.totalorder %s64_s26, 0  ;;  %s221_s28 = sand.u32 1, %s946_s20  }
  0x10   : > { %s679_s29 = sshll.u32 %s954_s22, 7  ;;  %s645_s6 = sshll.u32 %s221_s28, 7 }
  0x11   : > { %s1046_s30 = scalar_select %p65_p6, %s946_s20, %s67_s25  }
  0x12   : > { %s1227_s1 = sld [smem:[#allocation14_spill]]  ;;  %p1053_p7 = pnand %p708_p5, %p76_p4 }
  0x13   : > { %s223_s11 = scalar_lea.vmem [#allocation5], %s645_s6  ;;  %s1057_s13 = scalar_lea.sflag [#allocation6], %s219_s27 }
  0x14   : > { %s230_s12 = sshll.u32 %s223_s11, 4  ;;  %p794_p8 = pneg %p1053_p7  ;;  %s231_s12 = int_to_ptr.vmem [resolvable:$true] %s230_s12 }
  0x15   : > { %s805_s14 = scalar_lea.vmem %s231_s12, 2048  ;;  %s960_s15 = smov [#allocation5]  }
  0x16   : > { %p806_p9 = scmp.ne.s32.totalorder %s231_s12, %s805_s14  ;;  %s810_s16 = sshll.u32 %s960_s15, 4  ;;  %s811_s16 = int_to_ptr.vmem [resolvable:$false] %s810_s16 }
  0x17   : > { %s812_s17 = scalar_lea.vmem %s811_s16, 4096  ;;  %p813_p12 = scmp.lt.s32.totalorder %s231_s12, %s811_s16 }
  0x18   : > { %s229_s9 = scalar_lea.hbm %s1227_s1, %s679_s29  ;;  %p808_p10 = pnand %p806_p9, %p794_p8 }
  0x19   : > { %p814_p13 = scmp.lt.s32.totalorder %s812_s17, %s805_s14 }
  0x1a   : > { %p809_p11 = pneg %p808_p10 }
  0x1b   : > { %p815_p0 = por %p814_p13, %p813_p12 }
  0x1d   : > { %p816_p2 = pnand %p815_p0, %p809_p11 }
  0x1f   : > { %819 = shalt.err (!%p816_p2)
}
  0x20   : > { %s961_s25 = smov 256   ;;  %s962_s26 = smov 128  }
  0x21   : > { %s963_s27 = smov 8   ;;  %s1068_s29 = sadd.s32 4294967295, %s958_s23  }
  0x22   : > { %699 = dma.hbm_to_vmem [thread:$0]  (!%p1053_p7), %s229_s9, 2048, %s231_s12, %s1057_s13, %s961_s25, %s962_s26, %s963_s27  }
  0x23   : > { %s641_s6 = sadd.s32 4294967294, %s958_s23   ;;  %p80_p4 = scmp.ne.s32.totalorder %s942_s19, %s938_s18 }
  0x24   : > { %p1222_p5 = scmp.eq.s32.totalorder %s1068_s29, 0  ;;  %p174_p6 = scmp.eq.s32.totalorder %s1068_s29, 1 }
  0x25   : > { %p180_p9 = scmp.eq.s32.totalorder %s641_s6, 1  ;;  %p642_p11 = scmp.ge.s32.totalorder %s958_s23, 1 }
  0x26   : > { %p1077_p10 = por %p1222_p5, %p80_p4  ;;  %p1085_p12 = por %p174_p6, %p74_p1 }
  0x27   : > { %p1089_p13 = por %p180_p9, %p80_p4  ;;  %p187_p0 = scmp.lt.s32.totalorder %s958_s23, 3 }
  0x28   : > { %s1229_s7 = scalar_select %p1077_p10, 1, 0 }
  0x29   : > { %s1230_s8 = scalar_select %p1085_p12, 1, 0 }
  0x2a   : > { %s1231_s9 = scalar_select %p1089_p13, 1, 0 }
  0x2b   : > { %s648_s11 = sshll.u32 %s221_s28, 1  ;;  %p1096_p2 = pnand %p642_p11, %p187_p0 }
  0x2c   : > { %s964_s14 = smov [#allocation2]   ;;  %s680_s16 = sshll.u32 %s954_s22, 5 }
  0x2d   : > { %s202_s15 = sshll.u32 %s964_s14, 4  ;;  %p692_p1 = pneg %p1096_p2  ;;  %s1100_s15 = int_to_ptr.vmem [resolvable:$true] %s202_s15 }
  0x2e   : > { %s250_s26 = scalar_lea.hbm %s1215_s2, %s680_s16  ;;  %s244_s27 = scalar_lea.vmem [#allocation7], %s648_s11 }
  0x2f   : > { %s252_s6 = sshll.u32 %s244_s27, 4  ;;  %p1110_p4 = pnand %p692_p1, %p1222_p5  ;;  %s253_s6 = int_to_ptr.vmem [resolvable:$true] %s252_s6 }
  0x30   : > { %s833_s1 = scalar_lea.vmem %s253_s6, 32  ;;  %s965_s14 = smov [#allocation7]  }
  0x31   : > { %p834_p6 = scmp.ne.s32.totalorder %s253_s6, %s833_s1  ;;  %s838_s24 = sshll.u32 %s965_s14, 4  ;;  %s839_s24 = int_to_ptr.vmem [resolvable:$false] %s838_s24 }
  0x32   : > { %s840_s22 = scalar_lea.vmem %s839_s24, 64  ;;  %p841_p0 = scmp.lt.s32.totalorder %s253_s6, %s839_s24 }
  0x33   : > { %p836_p9 = pnand %p834_p6, %p794_p8  ;;  %p842_p3 = scmp.lt.s32.totalorder %s840_s22, %s833_s1 }
  0x35   : > { %p837_p11 = pneg %p836_p9  ;;  %p843_p13 = por %p842_p3, %p841_p0 }
  0x37   : > { %p844_p12 = pnand %p843_p13, %p837_p11 }
  0x39   : > { %847 = shalt.err (!%p844_p12)
}
  0x3a   : > { %702 = dma.hbm_to_vmem [thread:$0]  (!%p1053_p7), %s250_s26, 32, %s253_s6, %s1057_s13  }
  0x3b   : > { %p850_p8 = pneg %p1110_p4  ;;  %s859_s11 = scalar_lea.vmem %s1100_s15, 64 }
  0x3c   : > { %p860_p1 = scmp.ne.s32.totalorder %s1100_s15, %s859_s11  ;;  %p867_p5 = scmp.lt.s32.totalorder %s1100_s15, %s1100_s15 }
  0x3d   : > { %p868_p10 = scmp.lt.s32.totalorder %s859_s11, %s859_s11 }
  0x3e   : > { %p862_p6 = pnand %p860_p1, %p850_p8 }
  0x3f   : > { %p869_p3 = por %p868_p10, %p867_p5 }
  0x40   : > { %p863_p9 = pneg %p862_p6 }
  0x42   : > { %p870_p13 = pnand %p869_p3, %p863_p9 }
  0x44   : > { %873 = shalt.err (!%p870_p13)
}
  0x45   : > { %695 = dma.hbm_to_vmem [thread:$0]  (!%p1110_p4), %s1213_s0, 64, %s1100_s15, [#allocation3]  }
  0x46   : > { %261 = sbr.rel (%p1096_p2) target bundleno = 632 (0x278), region = 40  ;;  %p1234_p7 = scmp.eq.s32.totalorder (!%p1096_p2), %s1068_s29, 0 }
  0x4b   : > { %925 = dma.done.wait (%p1234_p7), [#allocation3], 64   ;;  %p1235_p12 = pmov %p1234_p7 }
  0x4c   : > { %s267_s24 = sand.u32 1, %s1068_s29   ;;  %s1140_s10 = sand.u32 1, %s942_s19  }
  0x4d   : > { %927 = vsyncadd (%p1235_p12), [#allocation3], 4294967232  ;;  %s653_s13 = sshll.u32 %s1140_s10, 7  ;;  %s268_s16 = scalar_lea.sflag [#allocation6], %s267_s24 }
  0x4e   : > { %s1143_s17 = scalar_lea.vmem [#allocation5], %s653_s13  ;;  %p1236_p5 = scmp.ne.s32.totalorder %s1229_s7, 0 }
  0x50   : > { %929 = dma.done.wait (%p1236_p5), %s268_s16, 2080  }
  0x51   : > { %931 = vsyncadd (%p1236_p5), %s268_s16, 4294965216  ;;  %v966_v0 = vmov 0   ;;  %v764_v1 = vld [vmem:[%s1143_s17 + $0x74] ss:$8 sps:$4 sm:$0xff]   ;;  %v766_v2 = vld [vmem:[%s1143_s17 + $0x70] ss:$8 sps:$4 sm:$0xff]   ;;  %v335_v18 = vlaneseq }
  0x52   : > { %457 = vmatprep.mubr.bf16.mxu0 %v966_v0  ;;  %425 = vmatprep.subr.bf16.mxu0 %v764_v1  ;;  %v767_v3 = vld [vmem:[%s1143_s17 + $0x64] ss:$8 sps:$4 sm:$0xff]   ;;  %v769_v4 = vld [vmem:[%s1143_s17 + $0x60] ss:$8 sps:$4 sm:$0xff]   ;;  %v770_v5 = vld [vmem:[%s1143_s17 + $0x54] ss:$8 sps:$4 sm:$0xff]  }
  0x53   : > { %426 = vmatpush1.bf16.msra.mxu0 %v766_v2  ;;  %v772_v6 = vld [vmem:[%s1143_s17 + $0x50] ss:$8 sps:$4 sm:$0xff]   ;;  %v773_v7 = vld [vmem:[%s1143_s17 + $0x44] ss:$8 sps:$4 sm:$0xff]   ;;  %v775_v8 = vld [vmem:[%s1143_s17 + $0x40] ss:$8 sps:$4 sm:$0xff]  }
  0x54   : > { %427 = vmatprep.subr.bf16.mxu0 %v767_v3  ;;  %v776_v9 = vld [vmem:[%s1143_s17 + $0x34] ss:$8 sps:$4 sm:$0xff]   ;;  %v778_v10 = vld [vmem:[%s1143_s17 + $0x30] ss:$8 sps:$4 sm:$0xff]   ;;  %v779_v11 = vld [vmem:[%s1143_s17 + $0x24] ss:$8 sps:$4 sm:$0xff]  }
  0x55   : > { %v781_v12 = vld [vmem:[%s1143_s17 + $0x20] ss:$8 sps:$4 sm:$0xff]   ;;  %v782_v13 = vld [vmem:[%s1143_s17 + $0x14] ss:$8 sps:$4 sm:$0xff]   ;;  %v784_v14 = vld [vmem:[%s1143_s17 + $0x10] ss:$8 sps:$4 sm:$0xff]  }
  0x56   : > { %v785_v15 = vld [vmem:[%s1143_s17 + $0x4] ss:$8 sps:$4 sm:$0xff]   ;;  %v787_v16 = vld [vmem:[%s1143_s17] ss:$8 sps:$4 sm:$0xff]   ;;  %v316_v17 = vld [vmem:[#allocation2] sm:$0xf] }
  0x57   : > { %428 = vmatpush1.bf16.msra.mxu0 %v769_v4  ;;  %s654_s29 = sshll.u32 %s1140_s10, 1  ;;  %v336_v19 = vshrl.u32 %v335_v18, 7  ;;  %v672_v46 = vld [vmem:[%s1216_s3] ss:$0 sm:$0xff]  ;;  %s655_s25 = sshll.u32 %s1140_s10, 4 }
  0x58   : > { %429 = vmatprep.subr.bf16.mxu0 %v770_v5  ;;  %s280_s7 = scalar_lea.vmem [#allocation7], %s654_s29  ;;  %v673_v48 = vld [vmem:[%s1217_s4] ss:$0 sm:$0xff]  ;;  %s681_s6 = sshll.u32 %s950_s21, 8 }
  0x59   : > { %v337_v20 = vsub.s32 0, %v336_v19  ;;  %v333_v21 = vld [vmem:[%s280_s7] sm:$0x3]  ;;  %v341_v23 = vsub.s32 1, %v336_v19  ;;  %s311_s28 = scalar_lea.vmem [#allocation8], %s655_s25  ;;  %s523_s22 = scalar_lea.hbm %s1218_s5, %s681_s6 }
  0x5a   : > { %s525_s14 = sshll.u32 %s311_s28, 4  ;;  %s509_s24 = scalar_lea.sflag [#allocation4], %s1140_s10  ;;  %s526_s14 = int_to_ptr.vmem [resolvable:$true] %s525_s14 }
  0x5b   : > { %430 = vmatpush1.bf16.msra.mxu0 %v772_v6  ;;  %v338_v22 = vrot.slane %v333_v21, %v337_v20  ;;  %v342_v26 = vrot.slane %v333_v21, %v341_v23  ;;  %s874_s13 = scalar_lea.vmem %s526_s14, 256  ;;  %p1237_p2 = scmp.ne.s32.totalorder %s1230_s8, 0 }
  0x5c   : > { %431 = vmatprep.subr.bf16.mxu0 %v773_v7  ;;  %p875_p10 = scmp.ne.s32.totalorder %s526_s14, %s874_s13  ;;  %s967_s16 = smov [#allocation8]  }
  0x5d   : > { %s878_s17 = sshll.u32 %s967_s16, 4  ;;  %s879_s17 = int_to_ptr.vmem [resolvable:$false] %s878_s17 }
  0x5e   : > { %p876_p4 = pnand %p875_p10, %p1237_p2  ;;  %s880_s21 = scalar_lea.vmem %s879_s17, 512 }
  0x5f   : > { %432 = vmatpush1.bf16.msra.mxu0 %v775_v8  ;;  %p881_p0 = scmp.lt.s32.totalorder %s526_s14, %s879_s17  ;;  %p882_p8 = scmp.lt.s32.totalorder %s880_s21, %s874_s13 }
  0x60   : > { %433 = vmatprep.subr.bf16.mxu0 %v776_v9  ;;  %p877_p11 = pneg %p876_p4 }
  0x61   : > { %p883_p1 = por %p882_p8, %p881_p0 }
  0x63   : > { %434 = vmatpush1.bf16.msra.mxu0 %v778_v10  ;;  %p884_p6 = pnand %p883_p1, %p877_p11 }
  0x64   : > { %435 = vmatprep.subr.bf16.mxu0 %v779_v11 }
  0x67   : > { %436 = vmatpush1.bf16.msra.mxu0 %v781_v12 }
  0x68   : > { %437 = vmatprep.subr.bf16.mxu0 %v782_v13 }
  0x6b   : > { %438 = vmatpush1.bf16.msra.mxu0 %v784_v14 }
  0x6c   : > { %439 = vmatprep.subr.bf16.mxu0 %v785_v15 }
  0x6f   : > { %440 = vmatpush1.bf16.msra.mxu0 %v787_v16 }
  0x72   : > { %458 = vmatmul.mubr.bf16.vlgmr.msra.gmra.mxu0 %v316_v17 }
 0x132   : > { %v459_v24 = vpop.f32.mrf.mxu0 }
 0x133   : > { %v460_v25 = vadd.f32 %v459_v24, %v338_v22 }
 0x134   : > { %v461_v27 = vpop.f32.mrf.mxu0 }
 0x135   : > { %468 = vadd.xlane.f32.xlu0 %v460_v25  ;;  %v462_v29 = vadd.f32 %v461_v27, %v342_v26 }
 0x136   : > { %v463_v28 = vpop.f32.mrf.mxu0 }
 0x138   : > { %v464_v30 = vpop.f32.mrf.mxu0 }
 0x139   : > { %494 = vadd.xlane.f32.xlu0 %v462_v29 }
 0x1be   : > { %v469_v31 = vpop.xlane.xlu0 %468 }
 0x1bf   : > { %v470_v32 = vmul.f32 0.0078125, %v469_v31 }
 0x1c1   : > { %v471_v33 = vsub.f32 %v460_v25, %v470_v32 }
 0x1c2   : > { %v495_v34 = vpop.xlane.xlu0 %494 }
 0x1c3   : > { %v496_v35 = vmul.f32 0.0078125, %v495_v34  ;;  %v472_v36 = vmul.f32 %v471_v33, %v471_v33 }
 0x1c5   : > { %v497_v37 = vsub.f32 %v462_v29, %v496_v35  ;;  %473 = vadd.xlane.f32.xlu1 %v472_v36 }
 0x1c7   : > { %v498_v38 = vmul.f32 %v497_v37, %v497_v37 }
 0x1c9   : > { %499 = vadd.xlane.f32.xlu1 %v498_v38 }
 0x24e   : > { %v474_v39 = vpop.xlane.xlu1 %473 }
 0x24f   : > { %v475_v40 = vmul.f32 0.0078125, %v474_v39 }
 0x251   : > { %v476_v41 = vadd.f32 1e-05, %v475_v40 }
 0x252   : > { %v500_v42 = vpop.xlane.xlu1 %499 }
 0x253   : > { %788 = vrsqrt.f32 %v476_v41  ;;  %v501_v43 = vmul.f32 0.0078125, %v500_v42 }
 0x255   : > { %v502_v44 = vadd.f32 1e-05, %v501_v43 }
 0x257   : > { %790 = vrsqrt.f32 %v502_v44 }
 0x260   : > { %v789_v45 = vpop.eup %788 }
 0x261   : > { %v478_v47 = vmul.f32 %v789_v45, %v471_v33 }
 0x263   : > { %v485_v49 = vmul.f32 %v672_v46, %v478_v47 }
 0x264   : > { %v791_v50 = vpop.eup %790 }
 0x265   : > { %v504_v51 = vmul.f32 %v791_v50, %v497_v37  ;;  %v492_v52 = vadd.f32 %v673_v48, %v485_v49 }
 0x267   : > { %493 = vst [vmem:[%s311_s28] sm:$0xff] %v492_v52  ;;  %v505_v53 = vmul.f32 %v672_v46, %v504_v51 }
 0x269   : > { %v506_v54 = vadd.f32 %v673_v48, %v505_v53 }
 0x26b   : > { %507 = vst [vmem:[%s311_s28 + $0x8] sm:$0xff] %v506_v54 }
 0x26c   : > { %887 = shalt.err (!%p884_p6)
}
 0x26d   : > { %s888_s29 = scalar_lea.hbm %s523_s22, 256  ;;  %s892_s12 = scalar_lea.hbm %s1218_s5, 512 }
 0x26e   : > { %p889_p9 = scmp.ne.s32.totalorder %s523_s22, %s888_s29  ;;  %p893_p7 = scmp.lt.s32.totalorder %s523_s22, %s1218_s5 }
 0x26f   : > { %p894_p12 = scmp.lt.s32.totalorder %s892_s12, %s888_s29 }
 0x270   : > { %p890_p3 = pnand %p889_p9, %p1237_p2 }
 0x271   : > { %p895_p5 = por %p894_p12, %p893_p7 }
 0x272   : > { %p891_p13 = pneg %p890_p3 }
 0x274   : > { %p896_p10 = pnand %p895_p5, %p891_p13 }
 0x276   : > { %899 = shalt.err (!%p896_p10)
}
 0x277   : > { %690 = dma.vmem_to_hbm [thread:$0]  (%p1237_p2), %s526_s14, 256, %s523_s22, %s509_s24  }
 0x278 PF: > { %s537_s26 = sand.u32 1, %s938_s18   ;;  %p1238_p4 = scmp.ne.s32.totalorder %s1231_s9, 0 }
 0x279   : > { %p1239_p11 = scmp.ge.s32.totalorder %s958_s23, 2  ;;  %s538_s27 = scalar_lea.sflag [#allocation4], %s537_s26 }
 0x27b   : > { %p704_p0 = pnand %p1239_p11, %p1238_p4 }
 0x27d   : > { %p705_p8 = pneg %p704_p0 }
 0x27f   : > { %933 = dma.done.wait (%p705_p8), %s538_s27, 256  }
 0x280   : > { %935 = vsyncadd (%p705_p8), %s538_s27, 4294967040  ;;  %s22_s23 = sadd.s32 1, %s958_s23   ;;  %s1240_s21 = sld [smem:[#allocation12_spill]] }
 0x281   : > { %p19_p1 = scmp.ge.s32.totalorder %s22_s23, 4   ;;  %s1241_s22 = sld [smem:[#allocation13_spill]] }
 0x282   : > { %s1242_s18 = smov %s942_s19  ;;  %s1243_s19 = smov %s946_s20 }
 0x283   : > { %s1244_s20 = smov %s1046_s30  ;;  %21 = sbr.rel (!%p19_p1) target bundleno = 9 (0x9), region = 102 }
 0x288   :  { %543 = vsyncpa [#allocation3], 1 }
 0x289   :  { %545 = vsyncpa [#allocation3 + $0x1], 1 }
 0x28a   :  { %546 = vsyncpa [#allocation6], 1 }
 0x28b   :  { %548 = vsyncpa [#allocation6 + $0x1], 1 }
 0x28c   :  { %549 = vsyncpa [#allocation4], 1 }
 0x28d   :  { %551 = vsyncpa [#allocation4 + $0x1], 1 }

</bundles_post_ra>
